<compile_context>
chip_gen: v5e
topology: v5e:2x2
jax: 0.10.0
libtpu: 0.0.40
codegen_flags: <defaults>
</compile_context>

<pallas_src>
import functools

import jax
import jax.numpy as jnp
from jax import lax
from jax.experimental import pallas as pl
from jax.experimental.pallas import tpu as pltpu


def _round_up(v, m):
    return (v + m - 1) // m * m


def _lora_kernel(x_ref, wf_ref, a_ref, b_ref, o_ref, acc_ref, xa_ref, *, scaling):
    j = pl.program_id(1)          # output-column tile
    k = pl.program_id(2)          # reduction (in_features) tile
    nk = pl.num_programs(2)

    @pl.when(k == 0)
    def _():
        acc_ref[...] = jnp.zeros_like(acc_ref)

    @pl.when((j == 0) & (k == 0))
    def _():
        xa_ref[...] = jnp.zeros_like(xa_ref)

    x = x_ref[...]                                    # (tm, tk) bf16

    # Frozen path: x @ W^T, weight kept in its native (out, in) layout.
    acc_ref[...] += lax.dot_general(
        x, wf_ref[...], (((1,), (1,)), ((), ())),
        preferred_element_type=jnp.float32)

    # Low-rank down-projection, computed once per M-tile (j == 0 pass only)
    # and reused by every subsequent output-column tile of the same M-tile.
    @pl.when(j == 0)
    def _():
        xa_ref[...] += lax.dot_general(
            x, a_ref[...], (((1,), (1,)), ((), ())),
            preferred_element_type=jnp.float32)

    @pl.when(k == nk - 1)
    def _():
        # bf16 round of the intermediate mirrors PyTorch's bf16 Linear->Linear.
        xa = xa_ref[...].astype(b_ref.dtype)          # (tm, rank)
        lora = lax.dot_general(
            xa, b_ref[...], (((1,), (1,)), ((), ())),
            preferred_element_type=jnp.float32)       # (tm, tn)
        o_ref[...] = (acc_ref[...] + scaling * lora).astype(o_ref.dtype)


def lora_linear(x, frozen_w, lora_a, lora_b, scaling, *, tm=256, tn=512, tk=1024):
    """x: (..., in). frozen_w: (out, in). lora_a: (rank, in). lora_b: (out, rank)."""
    orig_shape = x.shape
    in_features = orig_shape[-1]
    out_features = frozen_w.shape[0]
    rank = lora_a.shape[0]

    x2d = x.reshape(-1, in_features)
    m = x2d.shape[0]

    # Clamp tiles to the (padded) problem size, keeping MXU / lane alignment.
    tm = min(tm, _round_up(m, 16))               # bf16 sublane packing
    tn = min(tn, _round_up(out_features, 128))   # lane-dense output stores
    tk = min(tk, _round_up(in_features, 128))

    mp = _round_up(m, tm)
    np_ = _round_up(out_features, tn)
    kp = _round_up(in_features, tk)

    # Zero padding contributes nothing to any of the matmuls.
    if (mp, kp) != (m, in_features):
        x2d = jnp.pad(x2d, ((0, mp - m), (0, kp - in_features)))
    wf = frozen_w
    if (np_, kp) != (out_features, in_features):
        wf = jnp.pad(frozen_w, ((0, np_ - out_features), (0, kp - in_features)))
    a = lora_a if kp == in_features else jnp.pad(lora_a, ((0, 0), (0, kp - in_features)))
    b = lora_b if np_ == out_features else jnp.pad(lora_b, ((0, np_ - out_features), (0, 0)))

    grid = (mp // tm, np_ // tn, kp // tk)
    kernel = functools.partial(_lora_kernel, scaling=float(scaling))

    out = pl.pallas_call(
        kernel,
        out_shape=jax.ShapeDtypeStruct((mp, np_), x.dtype),
        grid_spec=pltpu.PrefetchScalarGridSpec(
            num_scalar_prefetch=0,
            grid=grid,
            in_specs=[
                pl.BlockSpec((tm, tk), lambda i, j, k: (i, k)),      # x
                pl.BlockSpec((tn, tk), lambda i, j, k: (j, k)),      # frozen_W (out, in)
                pl.BlockSpec((rank, tk), lambda i, j, k: (0, k)),    # lora_A (rank, in)
                pl.BlockSpec((tn, rank), lambda i, j, k: (j, 0)),    # lora_B (out, rank)
            ],
            out_specs=pl.BlockSpec((tm, tn), lambda i, j, k: (i, j)),
            scratch_shapes=[
                pltpu.VMEM((tm, tn), jnp.float32),    # frozen-path f32 accumulator
                pltpu.VMEM((tm, rank), jnp.float32),  # xa = x @ A^T accumulator
            ],
        ),
        compiler_params=pltpu.CompilerParams(
            # j must stay "arbitrary": the xa scratch filled on its first pass
            # is reused by later j tiles, so only M is megacore-sharded.
            dimension_semantics=("parallel", "arbitrary", "arbitrary"),
            vmem_limit_bytes=64 * 1024 * 1024,
        ),
    )(x2d, wf, a, b)

    out = out[:m, :out_features]
    return out.reshape(*orig_shape[:-1], out_features)


def _reference(x, frozen_w, lora_a, lora_b, scaling):
    # Pure-JAX reference mirroring the PyTorch forward.
    xf = x.astype(jnp.float32)
    xa = jnp.dot(xf, lora_a.T.astype(jnp.float32)).astype(jnp.bfloat16)
    lora = jnp.dot(xa.astype(jnp.float32), lora_b.T.astype(jnp.float32))
    base = jnp.dot(xf, frozen_w.T.astype(jnp.float32))
    return (base + scaling * lora).astype(x.dtype)


def _make_inputs(key, batch, seq, in_features, out_features, rank, dtype):
    kx, ka, kb, kw = jax.random.split(key, 4)
    x = jax.random.normal(kx, (batch, seq, in_features), jnp.float32).astype(dtype)
    lora_a = (jax.random.uniform(ka, (rank, in_features), jnp.float32, -1.0, 1.0)
              / jnp.sqrt(in_features)).astype(dtype)
    lora_b = (jax.random.uniform(kb, (out_features, rank), jnp.float32, -1.0, 1.0)
              / jnp.sqrt(rank)).astype(dtype)
    frozen_w = (jax.random.uniform(kw, (out_features, in_features), jnp.float32, -1.0, 1.0)
                / jnp.sqrt(in_features)).astype(dtype)
    return x, frozen_w, lora_a, lora_b


if __name__ == "__main__":
    dtype = jnp.bfloat16
    scaling = 2.0
    key = jax.random.PRNGKey(0)
    k1, k2 = jax.random.split(key)

    # Check 1: small module-like shapes (single-tile grid, padded out/in dims).
    batch, seq, in_features, out_features, rank = 2, 8, 32, 64, 8
    x, frozen_w, lora_a, lora_b = _make_inputs(
        k1, batch, seq, in_features, out_features, rank, dtype)
    y = jax.block_until_ready(lora_linear(x, frozen_w, lora_a, lora_b, scaling))
    y_ref = _reference(x, frozen_w, lora_a, lora_b, scaling)
    assert y.shape == (batch, seq, out_features) and y.dtype == dtype
    err = jnp.max(jnp.abs(y.astype(jnp.float32) - y_ref.astype(jnp.float32)))
    assert float(err) < 1e-1, f"mismatch vs reference (check 1): {err}"

    # Check 2: exercise the multi-tile grid path (M/N/K > 1 tile) with small
    # forced tiles to validate the accumulator / xa-reuse / pl.when logic.
    batch, seq, in_features, out_features, rank = 2, 16, 256, 256, 8
    x, frozen_w, lora_a, lora_b = _make_inputs(
        k2, batch, seq, in_features, out_features, rank, dtype)
    y = jax.block_until_ready(
        lora_linear(x, frozen_w, lora_a, lora_b, scaling, tm=16, tn=128, tk=128))
    y_ref = _reference(x, frozen_w, lora_a, lora_b, scaling)
    assert y.shape == (batch, seq, out_features) and y.dtype == dtype
    err = jnp.max(jnp.abs(y.astype(jnp.float32) - y_ref.astype(jnp.float32)))
    assert float(err) < 2e-1, f"mismatch vs reference (check 2): {err}"

    print("KERNEL_OK")
</pallas_src>

<mosaic_0001>
module attributes {stable_mosaic.version = 11 : i64} {
  func.func @_lora_kernel(%arg0: i32, %arg1: i32, %arg2: i32, %arg3: memref<16x128xbf16, #tpu.memory_space<vmem>>, %arg4: memref<128x128xbf16, #tpu.memory_space<vmem>>, %arg5: memref<8x128xbf16, #tpu.memory_space<vmem>>, %arg6: memref<128x8xbf16, #tpu.memory_space<vmem>>, %arg7: memref<16x128xbf16, #tpu.memory_space<vmem>>, %arg8: memref<16x128xf32, #tpu.memory_space<vmem>>, %arg9: memref<16x8xf32, #tpu.memory_space<vmem>>) attributes {dimension_semantics = [#tpu.dimension_semantics<parallel>, #tpu.dimension_semantics<arbitrary>, #tpu.dimension_semantics<arbitrary>], iteration_bounds = array<i64: 1, 1, 1>, scalar_prefetch = 0 : i64, scratch_operands = 2 : i64, tpu.core_type = #tpu.core_type<tc>, window_params = [{transform_indices = @transform_0, window_bounds = array<i64: 16, 128>}, {transform_indices = @transform_1, window_bounds = array<i64: 128, 128>}, {transform_indices = @transform_2, window_bounds = array<i64: 8, 128>}, {transform_indices = @transform_3, window_bounds = array<i64: 128, 8>}, {transform_indices = @transform_4, window_bounds = array<i64: 16, 128>}]} {
    %c0_i32 = arith.constant 0 : i32
    %0 = arith.cmpi eq, %arg2, %c0_i32 : i32
    %1 = arith.extui %0 : i1 to i32
    %c0_i32_0 = arith.constant 0 : i32
    %2 = arith.cmpi ne, %1, %c0_i32_0 : i32
    scf.if %2 {
      %cst_15 = arith.constant 0.000000e+00 : f32
      %20 = vector.broadcast %cst_15 : f32 to vector<16x128xf32>
      %c0_16 = arith.constant 0 : index
      %c0_17 = arith.constant 0 : index
      %21 = vector.load %arg8[%c0_16, %c0_17] : memref<16x128xf32, #tpu.memory_space<vmem>>, vector<16x128xf32>
      tpu.vector_store %arg8[%c0_16, %c0_17], %20 {strides = array<i32>} : memref<16x128xf32, #tpu.memory_space<vmem>>, vector<16x128xf32>,
    } else {
    }
    %c0_i32_1 = arith.constant 0 : i32
    %3 = arith.cmpi eq, %arg1, %c0_i32_1 : i32
    %c0_i32_2 = arith.constant 0 : i32
    %4 = arith.cmpi eq, %arg2, %c0_i32_2 : i32
    %5 = arith.andi %3, %4 : i1
    %6 = arith.extui %5 : i1 to i32
    %c0_i32_3 = arith.constant 0 : i32
    %7 = arith.cmpi ne, %6, %c0_i32_3 : i32
    scf.if %7 {
      %cst_15 = arith.constant 0.000000e+00 : f32
      %20 = vector.broadcast %cst_15 : f32 to vector<16x8xf32>
      %c0_16 = arith.constant 0 : index
      %c0_17 = arith.constant 0 : index
      %21 = vector.load %arg9[%c0_16, %c0_17] : memref<16x8xf32, #tpu.memory_space<vmem>>, vector<16x8xf32>
      tpu.vector_store %arg9[%c0_16, %c0_17], %20 {strides = array<i32>} : memref<16x8xf32, #tpu.memory_space<vmem>>, vector<16x8xf32>,
    } else {
    }
    %c0 = arith.constant 0 : index
    %c0_4 = arith.constant 0 : index
    %8 = vector.load %arg3[%c0, %c0_4] : memref<16x128xbf16, #tpu.memory_space<vmem>>, vector<16x128xbf16>
    %c0_5 = arith.constant 0 : index
    %c0_6 = arith.constant 0 : index
    %9 = vector.load %arg8[%c0_5, %c0_6] : memref<16x128xf32, #tpu.memory_space<vmem>>, vector<16x128xf32>
    %c0_7 = arith.constant 0 : index
    %c0_8 = arith.constant 0 : index
    %10 = vector.load %arg4[%c0_7, %c0_8] : memref<128x128xbf16, #tpu.memory_space<vmem>>, vector<128x128xbf16>
    %cst = arith.constant dense<0.000000e+00> : vector<16x128xf32>
    %11 = tpu.matmul %8, %10, %cst {dimension_numbers = #tpu.dot_dimension_numbers<[1], [1], [0], [0], [0, 0, 1, 0], [], []>} : vector<16x128xbf16>, vector<128x128xbf16>, vector<16x128xf32> -> vector<16x128xf32>
    %12 = arith.addf %9, %11 : vector<16x128xf32>
    %c0_9 = arith.constant 0 : index
    %c0_10 = arith.constant 0 : index
    %13 = vector.load %arg8[%c0_9, %c0_10] : memref<16x128xf32, #tpu.memory_space<vmem>>, vector<16x128xf32>
    tpu.vector_store %arg8[%c0_9, %c0_10], %12 {strides = array<i32>} : memref<16x128xf32, #tpu.memory_space<vmem>>, vector<16x128xf32>,
    %c0_i32_11 = arith.constant 0 : i32
    %14 = arith.cmpi eq, %arg1, %c0_i32_11 : i32
    %15 = arith.extui %14 : i1 to i32
    %c0_i32_12 = arith.constant 0 : i32
    %16 = arith.cmpi ne, %15, %c0_i32_12 : i32
    scf.if %16 {
      %c0_15 = arith.constant 0 : index
      %c0_16 = arith.constant 0 : index
      %20 = vector.load %arg9[%c0_15, %c0_16] : memref<16x8xf32, #tpu.memory_space<vmem>>, vector<16x8xf32>
      %c0_17 = arith.constant 0 : index
      %c0_18 = arith.constant 0 : index
      %21 = vector.load %arg5[%c0_17, %c0_18] : memref<8x128xbf16, #tpu.memory_space<vmem>>, vector<8x128xbf16>
      %cst_19 = arith.constant dense<0.000000e+00> : vector<16x8xf32>
      %22 = tpu.matmul %8, %21, %cst_19 {dimension_numbers = #tpu.dot_dimension_numbers<[1], [1], [0], [0], [0, 0, 1, 0], [], []>} : vector<16x128xbf16>, vector<8x128xbf16>, vector<16x8xf32> -> vector<16x8xf32>
      %23 = arith.addf %20, %22 : vector<16x8xf32>
      %c0_20 = arith.constant 0 : index
      %c0_21 = arith.constant 0 : index
      %24 = vector.load %arg9[%c0_20, %c0_21] : memref<16x8xf32, #tpu.memory_space<vmem>>, vector<16x8xf32>
      tpu.vector_store %arg9[%c0_20, %c0_21], %23 {strides = array<i32>} : memref<16x8xf32, #tpu.memory_space<vmem>>, vector<16x8xf32>,
    } else {
    }
    %c0_i32_13 = arith.constant 0 : i32
    %17 = arith.cmpi eq, %arg2, %c0_i32_13 : i32
    %18 = arith.extui %17 : i1 to i32
    %c0_i32_14 = arith.constant 0 : i32
    %19 = arith.cmpi ne, %18, %c0_i32_14 : i32
    scf.if %19 {
      %c0_15 = arith.constant 0 : index
      %c0_16 = arith.constant 0 : index
      %20 = vector.load %arg9[%c0_15, %c0_16] : memref<16x8xf32, #tpu.memory_space<vmem>>, vector<16x8xf32>
      %21 = arith.truncf %20 : vector<16x8xf32> to vector<16x8xbf16>
      %c0_17 = arith.constant 0 : index
      %c0_18 = arith.constant 0 : index
      %22 = vector.load %arg6[%c0_17, %c0_18] : memref<128x8xbf16, #tpu.memory_space<vmem>>, vector<128x8xbf16>
      %cst_19 = arith.constant dense<0.000000e+00> : vector<16x128xf32>
      %23 = tpu.matmul %21, %22, %cst_19 {dimension_numbers = #tpu.dot_dimension_numbers<[1], [1], [0], [0], [0, 0, 1, 0], [], []>} : vector<16x8xbf16>, vector<128x8xbf16>, vector<16x128xf32> -> vector<16x128xf32>
      %c0_20 = arith.constant 0 : index
      %c0_21 = arith.constant 0 : index
      %24 = vector.load %arg8[%c0_20, %c0_21] : memref<16x128xf32, #tpu.memory_space<vmem>>, vector<16x128xf32>
      %cst_22 = arith.constant 2.000000e+00 : f32
      %25 = vector.broadcast %cst_22 : f32 to vector<16x128xf32>
      %26 = arith.mulf %25, %23 : vector<16x128xf32>
      %27 = arith.addf %24, %26 : vector<16x128xf32>
      %28 = arith.truncf %27 : vector<16x128xf32> to vector<16x128xbf16>
      %c0_23 = arith.constant 0 : index
      %c0_24 = arith.constant 0 : index
      %29 = vector.load %arg7[%c0_23, %c0_24] : memref<16x128xbf16, #tpu.memory_space<vmem>>, vector<16x128xbf16>
      tpu.vector_store %arg7[%c0_23, %c0_24], %28 {strides = array<i32>} : memref<16x128xbf16, #tpu.memory_space<vmem>>, vector<16x128xbf16>,
    } else {
    }
    return
  }
  func.func @transform_0(%arg0: i32, %arg1: i32, %arg2: i32) -> (i32, i32) {
    %c0_i32 = arith.constant 0 : i32
    return %arg0, %arg2 : i32, i32
  }
  func.func @transform_1(%arg0: i32, %arg1: i32, %arg2: i32) -> (i32, i32) {
    %c0_i32 = arith.constant 0 : i32
    return %arg1, %arg2 : i32, i32
  }
  func.func @transform_2(%arg0: i32, %arg1: i32, %arg2: i32) -> (i32, i32) {
    %c0_i32 = arith.constant 0 : i32
    %c0_i32_0 = arith.constant 0 : i32
    return %c0_i32, %arg2 : i32, i32
  }
  func.func @transform_3(%arg0: i32, %arg1: i32, %arg2: i32) -> (i32, i32) {
    %c0_i32 = arith.constant 0 : i32
    %c0_i32_0 = arith.constant 0 : i32
    return %arg1, %c0_i32 : i32, i32
  }
  func.func @transform_4(%arg0: i32, %arg1: i32, %arg2: i32) -> (i32, i32) {
    %c0_i32 = arith.constant 0 : i32
    return %arg0, %arg1 : i32, i32
  }
}

</mosaic_0001>

<bundles_post_ra>
// kernel: tpu_custom_call.1
= control target key start
LH: loop header
LB: loop body
LE: loop exit
PB: predicated region body
PF: predicated region fallthrough
CT: control target
= control target key end

     0   :  { %9 = vsyncpa [#allocation5], 0  ;;  %s553_s0 = inlined_call_operand.hbm [shape: bf16[16,128], index: 0, kind: input, shape index: {}]   ;;  %s554_s1 = inlined_call_operand.vmem [shape: bf16[128,128], index: 1, kind: input, shape index: {}]   ;;  %s555_s2 = inlined_call_operand.vmem [shape: bf16[8,128], index: 2, kind: input, shape index: {}]   ;;  %s556_s3 = inlined_call_operand.vmem [shape: bf16[128,8], index: 3, kind: input, shape index: {}]   ;;  %s557_s4 = inlined_call_operand.hbm [shape: bf16[16,128], index: 4, kind: output, shape index: {}]  }
   0x1   :  { %10 = vsyncpa [#allocation6], 0  ;;  %s15_s17 = sshll.u32 %s553_s0, 4  ;;  %s447_s18 = smov [#allocation4]   ;;  %s16_s17 = int_to_ptr.hbm [resolvable:$true] %s15_s17 }
   0x2   :  { %s17_s19 = sshll.u32 %s447_s18, 4  ;;  %s448_s20 = smov 64   ;;  %s18_s19 = int_to_ptr.vmem [resolvable:$true] %s17_s19 }
   0x3   :  { %s449_s21 = smov 4  }
   0x4   :  { %23 = dma.hbm_to_vmem [thread:$0]  %s16_s17, 128, %s18_s19, [#allocation5], %s448_s20, %s448_s20, %s449_s21  }
   0x5   :  { %443 = dma.done.wait [#allocation5], 128  }
   0x6   :  { %444 = vsyncadd [#allocation5], 4294967168  ;;  %v146_v0 = vld [vmem:[%s555_s2] sm:$0xf]  ;;  %v376_v1 = vld [vmem:[%s554_s1 + $0x38] sm:$0xff]  ;;  %vm46_vm0 = vcmask 64512  }
   0x7   :  { %154 = vmatpush.bf16.xpose.msra.mxu1 %v146_v0  ;;  %v384_v2 = vld [vmem:[%s556_s3 + $0x38] sm:$0xff]  ;;  %123 = vmatpush.bf16.xpose.msra.mxu0 %v376_v1  ;;  %v368_v4 = vld [vmem:[#allocation4] sm:$0xff]  ;;  %v382_v8 = vld [vmem:[%s556_s3 + $0x28] sm:$0xff]  ;;  %v450_v9 = vmov 0.0   ;;  %s286_s30 = sshll.u32 %s557_s4, 4  ;;  %s287_s30 = int_to_ptr.hbm [resolvable:$true] %s286_s30 }
   0x8   :  { %v254_v3 = vsel %vm46_vm0, %v384_v2, 0  ;;  %v383_v5 = vld [vmem:[%s556_s3 + $0x30] sm:$0xff]  ;;  %47 = vst.msk [vmem:[#allocation3] sm:$0xff] %vm46_vm0, %v450_v9  ;;  %v374_v10 = vld [vmem:[%s554_s1 + $0x28] sm:$0xff]  ;;  %v248_v11 = vsel %vm46_vm0, %v382_v8, 0  ;;  %v381_v12 = vld [vmem:[%s556_s3 + $0x20] sm:$0xff] }
   0x9   :  { %256 = vmatpush.bf16.xpose.msra.mxu2 %v254_v3  ;;  %v375_v6 = vld [vmem:[%s554_s1 + $0x30] sm:$0xff]  ;;  %v251_v7 = vsel %vm46_vm0, %v383_v5, 0  ;;  %48 = vst.msk [vmem:[#allocation3 + $0x8] sm:$0xff] %vm46_vm0, %v450_v9  ;;  %v373_v13 = vld [vmem:[%s554_s1 + $0x20] sm:$0xff]  ;;  %v245_v14 = vsel %vm46_vm0, %v381_v12, 0  ;;  %v380_v15 = vld [vmem:[%s556_s3 + $0x18] sm:$0xff] }
   0xa   :  { %v372_v16 = vld [vmem:[%s554_s1 + $0x18] sm:$0xff]  ;;  %v242_v17 = vsel %vm46_vm0, %v380_v15, 0  ;;  %v379_v18 = vld [vmem:[%s556_s3 + $0x10] sm:$0xff]  ;;  %v370_v21 = vld [vmem:[%s554_s1 + $0x8] sm:$0xff] }
   0xb   :  { %v371_v19 = vld [vmem:[%s554_s1 + $0x10] sm:$0xff]  ;;  %v239_v20 = vsel %vm46_vm0, %v379_v18, 0  ;;  %v378_v22 = vld [vmem:[%s556_s3 + $0x8] sm:$0xff]  ;;  %v369_v24 = vld [vmem:[%s554_s1] sm:$0xff]  ;;  %s451_s1 = smov [#allocation7]  }
   0xc   :  { %v236_v23 = vsel %vm46_vm0, %v378_v22, 0  ;;  %v377_v25 = vld [vmem:[%s556_s3] sm:$0xff]  ;;  %s284_s3 = sshll.u32 %s451_s1, 4  ;;  %s285_s3 = int_to_ptr.vmem [resolvable:$true] %s284_s3 }
   0xd   :  { %v233_v26 = vsel %vm46_vm0, %v377_v25, 0 }
   0xe   :  { %155 = vmatmul.bf16.vlgmr.msra.gmra.mxu1 %v368_v4 }
   0xf   :  { %124 = vmatpush.bf16.xpose.msra.mxu0 %v375_v6  ;;  %v144_v27 = vld [vmem:[#allocation3] sm:$0xff] }
  0x10   :  { %v145_v30 = vld [vmem:[#allocation3 + $0x8] sm:$0xff] }
  0x11   :  { %257 = vmatpush.bf16.xpose.msra.mxu2 %v251_v7 }
  0x17   :  { %125 = vmatpush.bf16.xpose.msra.mxu0 %v374_v10 }
  0x19   :  { %258 = vmatpush.bf16.xpose.msra.mxu2 %v248_v11 }
  0x1f   :  { %126 = vmatpush.bf16.xpose.msra.mxu0 %v373_v13 }
  0x21   :  { %259 = vmatpush.bf16.xpose.msra.mxu2 %v245_v14 }
  0x27   :  { %127 = vmatpush.bf16.xpose.msra.mxu0 %v372_v16 }
  0x29   :  { %260 = vmatpush.bf16.xpose.msra.mxu2 %v242_v17 }
  0x2f   :  { %128 = vmatpush.bf16.xpose.msra.mxu0 %v371_v19 }
  0x31   :  { %261 = vmatpush.bf16.xpose.msra.mxu2 %v239_v20 }
  0x37   :  { %129 = vmatpush.bf16.xpose.msra.mxu0 %v370_v21 }
  0x39   :  { %262 = vmatpush.bf16.xpose.msra.mxu2 %v236_v23 }
  0x3f   :  { %130 = vmatpush.bf16.xpose.msra.mxu0 %v369_v24 }
  0x41   :  { %263 = vmatpush.bf16.xpose.msra.mxu2 %v233_v26 }
  0x46   :  { %131 = vmatmul.bf16.vlgmr.msra.gmra.mxu0 %v368_v4 }
  0x8b   :  { %v156_v28 = vpop.f32.mrf.mxu1 }
  0x8c   :  { %v161_v29 = vadd.f32 %v156_v28, %v144_v27 }
  0x8e   :  { %164 = vst.msk [vmem:[#allocation3] sm:$0xff] %vm46_vm0, %v161_v29 }
  0x93   :  { %v158_v31 = vpop.f32.mrf.mxu1 }
  0x94   :  { %v162_v32 = vadd.f32 %v158_v31, %v145_v30 }
  0x95   :  { %v169_v33 = vld [vmem:[#allocation3] sm:$0xff] }
  0x96   :  { %165 = vst.msk [vmem:[#allocation3 + $0x8] sm:$0xff] %vm46_vm0, %v162_v32 }
  0x9d   :  { %v170_v34 = vld [vmem:[#allocation3 + $0x8] sm:$0xff] }
  0x9e   :  { %v171_v35 = vpack.c.bf16 %v170_v34, %v169_v33 }
  0xa0   :  { %367 = vmatmul.msk.bf16.vlgmr.msra.gmra.mxu2 %vm46_vm0, %v171_v35 }
  0xc3   :  { %v132_v36 = vpop.f32.mrf.mxu0 }
  0xcb   :  { %v134_v41 = vpop.f32.mrf.mxu0 }
 0x123   :  { %v265_v37 = vpop.f32.mrf.mxu2 }
 0x124   :  { %v272_v38 = vmul.f32 2.0, %v265_v37 }
 0x126   :  { %v274_v42 = vadd.f32 %v272_v38, %v132_v36 }
 0x12b   :  { %v267_v39 = vpop.f32.mrf.mxu2 }
 0x12c   :  { %v273_v40 = vmul.f32 2.0, %v267_v39 }
 0x12e   :  { %v275_v43 = vadd.f32 %v273_v40, %v134_v41 }
 0x130   :  { %v388_v44 = vpack.c.bf16 %v275_v43, %v274_v42 }
 0x132   :  { %389 = vst [vmem:[#allocation7] sm:$0xff] %v388_v44  }
 0x133   :  { %292 = dma.vmem_to_hbm [thread:$0]  %s285_s3, 128, %s287_s30, [#allocation6], %s448_s20, %s448_s20, %s449_s21  }
 0x134   :  { %445 = dma.done.wait [#allocation6], 128  }
 0x135   :  { %446 = vsyncadd [#allocation6], 4294967168 }
 0x136   :  { %297 = vsyncpa [#allocation5], 1 }
 0x137   :  { %298 = vsyncpa [#allocation6], 1 }

</bundles_post_ra>
